<compile_context>
chip_gen: v5e
topology: v5e:2x2
jax: 0.10.0
libtpu: 0.0.40
codegen_flags: <defaults>
</compile_context>

<pallas_src>
import functools

import jax
import jax.numpy as jnp
from jax.experimental import pallas as pl
from jax.experimental.pallas import tpu as pltpu


def _round_up(x, m):
    return ((x + m - 1) // m) * m


def _round_down(x, m):
    return (x // m) * m


def _weighted_mse_kernel(w_ref, p_ref, t_ref, o_ref, acc_ref, *,
                         n_rows, n_cols, block_rows, block_cols,
                         mask_rows, mask_cols):
    """Per grid step: acc(1, tc) += column-wise row-sum of w * (p - t)^2.

    Grid = (row_blocks, col_blocks).  Column axis is the reduction
    ("arbitrary"); row axis is independent ("parallel") and emits one scalar
    partial per row block (broadcast into a lane-dense (1, 8, 128) out block).
    """
    j = pl.program_id(1)

    @pl.when(j == 0)
    def _init():
        acc_ref[...] = jnp.zeros_like(acc_ref)

    p = p_ref[...].astype(jnp.float32)          # (tr, tc)
    t = t_ref[...].astype(jnp.float32)
    w = w_ref[...].astype(jnp.float32)          # (1, tc): broadcasts over rows

    d = p - t
    prod = w * (d * d)                          # (tr, tc) weighted squared diff

    if mask_rows or mask_cols:
        ok = None
        if mask_rows:
            i = pl.program_id(0)
            r = jax.lax.broadcasted_iota(jnp.int32, prod.shape, 0) + i * block_rows
            ok = r < n_rows
        if mask_cols:
            c = jax.lax.broadcasted_iota(jnp.int32, prod.shape, 1) + j * block_cols
            okc = c < n_cols
            ok = okc if ok is None else jnp.logical_and(ok, okc)
        # Mask the product itself (not just via w == 0): out-of-bounds VMEM may
        # hold Inf/NaN garbage and 0 * NaN == NaN.
        prod = jnp.where(ok, prod, 0.0)

    # Row reduction to a single sublane: keeps the accumulator tiny (no full
    # (tr, tc) read-modify-write per step) and shrinks the final reduce.
    acc_ref[...] += jnp.sum(prod, axis=0, keepdims=True)

    @pl.when(j == pl.num_programs(1) - 1)
    def _finalize():
        partial = jnp.sum(acc_ref[...])         # scalar partial for this row block
        o_ref[...] = jnp.zeros_like(o_ref) + partial


def _vmem_budget_bytes():
    """Generation-aware VMEM plan: working-set budget + scoped-VMEM limit."""
    try:
        cap = int(pltpu.get_tpu_info().vmem_capacity_bytes)   # 128 MiB v5e/v6e, 64 MiB v7x
    except Exception:
        cap = 64 << 20                                        # conservative fallback
    cap = max(cap, 32 << 20)
    budget = (cap * 3) // 4                   # streaming working set (blocks + acc)
    limit = min(cap, budget + (8 << 20))      # leave headroom for compiler scratch
    return budget, limit


def _tile_plan(n_rows, n_cols, itemsize, budget_bytes, row_cap=None, col_cap=None):
    """Pick (tr, tc, n_row_blocks, n_col_blocks) for the (B, K) streaming layout."""
    sub = max(8, 32 // itemsize)              # 8 f32 / 16 bf16 / 32 int8-fp8 sublane granule

    def vmem_need(tr, tc):
        return (2 * 2 * tr * tc * itemsize    # pred + target, double-buffered
                + 8 * tc * 4                  # (1, tc) f32 acc (padded to 8 sublanes)
                + 2 * tc * 4                  # weights block, double-buffered
                + 2 * 8 * 128 * 4)            # output block

    # Columns: prefer a single full-width block (lane-dense, grid-resident weights).
    if (col_cap is None or n_cols <= col_cap) and vmem_need(sub, n_cols) <= budget_bytes:
        tc = n_cols
    else:
        start = n_cols if col_cap is None else max(1, min(n_cols, col_cap))
        tc = max(128, _round_down(start, 128))
        while tc > 128 and vmem_need(sub, tc) > budget_bytes:
            tc = max(128, _round_down(tc // 2, 128))
        tc = min(tc, n_cols)
    n_col_blocks = pl.cdiv(n_cols, tc)

    # Rows: as tall as the budget allows, capped at ~16 MiB per streamed block
    # so the pipeline still has multiple steps to overlap.
    tr_budget = (budget_bytes - (8 * tc * 4 + 2 * tc * 4 + 2 * 8 * 128 * 4)) \
        // (4 * tc * itemsize)
    tr_cap = (16 << 20) // (tc * itemsize)
    tr = min(_round_up(n_rows, sub), max(sub, tr_budget), max(sub, tr_cap))
    if row_cap is not None:
        tr = min(tr, max(sub, row_cap))
    if tr >= n_rows:
        tr = n_rows                            # single full-height block (no row mask)
    else:
        tr = max(sub, _round_down(tr, sub))    # aligned blocks, ragged last block masked
    n_row_blocks = pl.cdiv(n_rows, tr)
    return tr, tc, n_row_blocks, n_col_blocks


def weighted_mse_loss(predictions, targets, weight_fn, *,
                      row_block_cap=None, col_block_cap=None):
    """Pallas implementation of WeightedMSELoss.forward on (B, S, F) inputs."""
    assert predictions.shape == targets.shape
    B, S, F = predictions.shape
    K = S * F
    itemsize = jnp.dtype(predictions.dtype).itemsize

    # Per-timestep weights broadcast over features, flattened lane-dense (tiny).
    weights = jnp.asarray(weight_fn(S), dtype=jnp.float32).reshape(S)
    w_flat = jnp.broadcast_to(weights[:, None], (S, F)).reshape(1, K)

    p2 = predictions.reshape(B, K)             # metadata-only reshapes
    t2 = targets.reshape(B, K)

    budget, vmem_limit = _vmem_budget_bytes()
    tr, tc, n_row, n_col = _tile_plan(B, K, itemsize, budget,
                                      row_cap=row_block_cap, col_cap=col_block_cap)
    mask_rows = (n_row > 1) and (B % tr != 0)
    mask_cols = (n_col > 1) and (K % tc != 0)

    inv_total = 1.0 / float(B * K)
    cost = pl.CostEstimate(
        flops=5 * B * K,
        transcendentals=0,
        bytes_accessed=2 * B * K * itemsize + K * 4 + n_row * 8 * 128 * 4,
    )

    kernel = functools.partial(
        _weighted_mse_kernel,
        n_rows=B, n_cols=K, block_rows=tr, block_cols=tc,
        mask_rows=mask_rows, mask_cols=mask_cols)

    out = pl.pallas_call(
        kernel,
        out_shape=jax.ShapeDtypeStruct((n_row, 8, 128), jnp.float32),
        grid_spec=pltpu.PrefetchScalarGridSpec(
            num_scalar_prefetch=0,
            grid=(n_row, n_col),
            in_specs=[
                pl.BlockSpec((1, tc), lambda i, j: (0, j)),    # weights (grid-resident if n_col==1)
                pl.BlockSpec((tr, tc), lambda i, j: (i, j)),   # predictions
                pl.BlockSpec((tr, tc), lambda i, j: (i, j)),   # targets
            ],
            out_specs=pl.BlockSpec((1, 8, 128), lambda i, j: (i, 0, 0)),
            scratch_shapes=[pltpu.VMEM((1, tc), jnp.float32)],
        ),
        compiler_params=pltpu.CompilerParams(
            dimension_semantics=("parallel", "arbitrary"),
            vmem_limit_bytes=int(vmem_limit),
        ),
        cost_estimate=cost,
    )(w_flat, p2, t2)

    # Tiny host-side combine of per-row-block partials, then the global mean.
    return jnp.sum(out[:, 0, 0]) * jnp.float32(inv_total)


def _reference(predictions, targets, weight_fn):
    S = predictions.shape[1]
    w = jnp.asarray(weight_fn(S), dtype=jnp.float32).reshape(1, S, 1)
    d = predictions.astype(jnp.float32) - targets.astype(jnp.float32)
    return jnp.mean(w * d * d)


if __name__ == "__main__":
    # Deterministic weight function: linearly increasing per-timestep weights.
    def weight_fn(seq_len):
        return jnp.linspace(0.5, 1.5, seq_len, dtype=jnp.float32)

    # 1) Primary small case: (B, S, F) = (2, 8, 32), f32, single-block fast path.
    B, S, F = 2, 8, 32
    kp, kt = jax.random.split(jax.random.PRNGKey(0))
    predictions = jax.random.normal(kp, (B, S, F), dtype=jnp.float32)
    targets = jax.random.normal(kt, (B, S, F), dtype=jnp.float32)
    loss = jax.block_until_ready(weighted_mse_loss(predictions, targets, weight_fn))
    ref = _reference(predictions, targets, weight_fn)
    assert jnp.allclose(loss, ref, rtol=1e-5, atol=1e-6), (loss, ref)

    # 2) Misaligned shapes with forced row/column tiling: exercises the
    #    in-kernel masking, multi-step reduction and per-row-block partials.
    B2, S2, F2 = 10, 6, 40                      # K = 240 (not /128), B not /8
    kp2, kt2 = jax.random.split(jax.random.PRNGKey(1))
    pred2 = jax.random.normal(kp2, (B2, S2, F2), dtype=jnp.float32)
    targ2 = jax.random.normal(kt2, (B2, S2, F2), dtype=jnp.float32)
    loss2 = jax.block_until_ready(
        weighted_mse_loss(pred2, targ2, weight_fn, row_block_cap=8, col_block_cap=128))
    ref2 = _reference(pred2, targ2, weight_fn)
    assert jnp.allclose(loss2, ref2, rtol=1e-5, atol=1e-6), (loss2, ref2)

    # 3) bf16 inputs streamed as-is (kernel upcasts to f32 in-registers).
    kp3, kt3 = jax.random.split(jax.random.PRNGKey(2))
    pred3 = jax.random.normal(kp3, (4, 10, 48), dtype=jnp.bfloat16)
    targ3 = jax.random.normal(kt3, (4, 10, 48), dtype=jnp.bfloat16)
    loss3 = jax.block_until_ready(weighted_mse_loss(pred3, targ3, weight_fn))
    ref3 = _reference(pred3, targ3, weight_fn)
    assert jnp.allclose(loss3, ref3, rtol=1e-4, atol=1e-5), (loss3, ref3)

    print("KERNEL_OK")
</pallas_src>

<mosaic_0001>
module attributes {stable_mosaic.version = 11 : i64} {
  func.func @_weighted_mse_kernel(%arg0: i32, %arg1: i32, %arg2: memref<1x256xf32, #tpu.memory_space<vmem>>, %arg3: memref<2x256xf32, #tpu.memory_space<vmem>>, %arg4: memref<2x256xf32, #tpu.memory_space<vmem>>, %arg5: memref<1x8x128xf32, #tpu.memory_space<vmem>>, %arg6: memref<1x256xf32, #tpu.memory_space<vmem>>) attributes {dimension_semantics = [#tpu.dimension_semantics<parallel>, #tpu.dimension_semantics<arbitrary>], iteration_bounds = array<i64: 1, 1>, scalar_prefetch = 0 : i64, scratch_operands = 1 : i64, tpu.core_type = #tpu.core_type<tc>, window_params = [{transform_indices = @transform_0, window_bounds = array<i64: 1, 256>}, {transform_indices = @transform_1, window_bounds = array<i64: 2, 256>}, {transform_indices = @transform_2, window_bounds = array<i64: 2, 256>}, {transform_indices = @transform_3, window_bounds = array<i64: 1, 8, 128>}]} {
    %c0_i32 = arith.constant 0 : i32
    %0 = arith.cmpi eq, %arg1, %c0_i32 : i32
    %1 = arith.extui %0 : i1 to i32
    %c0_i32_0 = arith.constant 0 : i32
    %2 = arith.cmpi ne, %1, %c0_i32_0 : i32
    scf.if %2 {
      %cst_12 = arith.constant 0.000000e+00 : f32
      %18 = vector.broadcast %cst_12 : f32 to vector<1x256xf32>
      %c0_13 = arith.constant 0 : index
      %c0_14 = arith.constant 0 : index
      %19 = vector.load %arg6[%c0_13, %c0_14] : memref<1x256xf32, #tpu.memory_space<vmem>>, vector<1x256xf32>
      tpu.vector_store %arg6[%c0_13, %c0_14], %18 {strides = array<i32>} : memref<1x256xf32, #tpu.memory_space<vmem>>, vector<1x256xf32>,
    } else {
    }
    %c0 = arith.constant 0 : index
    %c0_1 = arith.constant 0 : index
    %3 = vector.load %arg3[%c0, %c0_1] : memref<2x256xf32, #tpu.memory_space<vmem>>, vector<2x256xf32>
    %c0_2 = arith.constant 0 : index
    %c0_3 = arith.constant 0 : index
    %4 = vector.load %arg4[%c0_2, %c0_3] : memref<2x256xf32, #tpu.memory_space<vmem>>, vector<2x256xf32>
    %c0_4 = arith.constant 0 : index
    %c0_5 = arith.constant 0 : index
    %5 = vector.load %arg2[%c0_4, %c0_5] : memref<1x256xf32, #tpu.memory_space<vmem>>, vector<1x256xf32>
    %6 = arith.subf %3, %4 : vector<2x256xf32>
    %7 = arith.mulf %6, %6 : vector<2x256xf32>
    %8 = vector.broadcast %5 : vector<1x256xf32> to vector<2x256xf32>
    %9 = arith.mulf %8, %7 : vector<2x256xf32>
    %c0_6 = arith.constant 0 : index
    %c0_7 = arith.constant 0 : index
    %10 = vector.load %arg6[%c0_6, %c0_7] : memref<1x256xf32, #tpu.memory_space<vmem>>, vector<1x256xf32>
    %cst = arith.constant dense<0.000000e+00> : vector<256xf32>
    %11 = vector.multi_reduction <add>, %9, %cst [0] : vector<2x256xf32> to vector<256xf32>
    %12 = vector.shape_cast %11 : vector<256xf32> to vector<1x256xf32>
    %13 = arith.addf %10, %12 : vector<1x256xf32>
    %c0_8 = arith.constant 0 : index
    %c0_9 = arith.constant 0 : index
    %14 = vector.load %arg6[%c0_8, %c0_9] : memref<1x256xf32, #tpu.memory_space<vmem>>, vector<1x256xf32>
    tpu.vector_store %arg6[%c0_8, %c0_9], %13 {strides = array<i32>} : memref<1x256xf32, #tpu.memory_space<vmem>>, vector<1x256xf32>,
    %c0_i32_10 = arith.constant 0 : i32
    %15 = arith.cmpi eq, %arg1, %c0_i32_10 : i32
    %16 = arith.extui %15 : i1 to i32
    %c0_i32_11 = arith.constant 0 : i32
    %17 = arith.cmpi ne, %16, %c0_i32_11 : i32
    scf.if %17 {
      %c0_12 = arith.constant 0 : index
      %c0_13 = arith.constant 0 : index
      %18 = vector.load %arg6[%c0_12, %c0_13] : memref<1x256xf32, #tpu.memory_space<vmem>>, vector<1x256xf32>
      %19 = vector.shape_cast %18 : vector<1x256xf32> to vector<1x1x256xf32>
      %cst_14 = arith.constant dense<0.000000e+00> : vector<1xf32>
      %20 = vector.multi_reduction <add>, %19, %cst_14 [1, 2] : vector<1x1x256xf32> to vector<1xf32>
      %21 = vector.shape_cast %20 : vector<1xf32> to vector<1x1x1xf32>
      %22 = vector.extract %21[0, 0, 0] : f32 from vector<1x1x1xf32>
      %cst_15 = arith.constant 0.000000e+00 : f32
      %23 = vector.broadcast %cst_15 : f32 to vector<1x8x128xf32>
      %24 = vector.broadcast %22 : f32 to vector<1x8x128xf32>
      %25 = arith.addf %23, %24 : vector<1x8x128xf32>
      %c0_16 = arith.constant 0 : index
      %c0_17 = arith.constant 0 : index
      %c0_18 = arith.constant 0 : index
      %26 = vector.load %arg5[%c0_16, %c0_17, %c0_18] : memref<1x8x128xf32, #tpu.memory_space<vmem>>, vector<1x8x128xf32>
      tpu.vector_store %arg5[%c0_16, %c0_17, %c0_18], %25 {strides = array<i32>} : memref<1x8x128xf32, #tpu.memory_space<vmem>>, vector<1x8x128xf32>,
    } else {
    }
    return
  }
  func.func @transform_0(%arg0: i32, %arg1: i32) -> (i32, i32) {
    %c0_i32 = arith.constant 0 : i32
    %c0_i32_0 = arith.constant 0 : i32
    return %c0_i32, %arg1 : i32, i32
  }
  func.func @transform_1(%arg0: i32, %arg1: i32) -> (i32, i32) {
    %c0_i32 = arith.constant 0 : i32
    return %arg0, %arg1 : i32, i32
  }
  func.func @transform_2(%arg0: i32, %arg1: i32) -> (i32, i32) {
    %c0_i32 = arith.constant 0 : i32
    return %arg0, %arg1 : i32, i32
  }
  func.func @transform_3(%arg0: i32, %arg1: i32) -> (i32, i32, i32) {
    %c0_i32 = arith.constant 0 : i32
    %c0_i32_0 = arith.constant 0 : i32
    %c0_i32_1 = arith.constant 0 : i32
    return %arg0, %c0_i32, %c0_i32_0 : i32, i32, i32
  }
}

</mosaic_0001>

<bundles_post_ra>
// kernel: tpu_custom_call.1
= control target key start
LH: loop header
LB: loop body
LE: loop exit
PB: predicated region body
PF: predicated region fallthrough
CT: control target
= control target key end

     0   :  { %8 = vsyncpa [#allocation4], 0  ;;  %s307_s0 = inlined_call_operand.hbm [shape: f32[1,256], index: 0, kind: input, shape index: {}]   ;;  %s308_s1 = inlined_call_operand.hbm [shape: f32[2,256], index: 1, kind: input, shape index: {}]   ;;  %s309_s2 = inlined_call_operand.hbm [shape: f32[2,256], index: 2, kind: input, shape index: {}]   ;;  %s310_s3 = inlined_call_operand.hbm [shape: f32[1,8,128], index: 3, kind: output, shape index: {}]  }
   0x1   :  { %9 = vsyncpa [#allocation7], 0  ;;  %s27_s14 = sshll.u32 %s308_s1, 4  ;;  %s28_s14 = int_to_ptr.hbm [resolvable:$true] %s27_s14 }
   0x2   :  { %10 = vsyncpa [#allocation5], 0  ;;  %s262_s15 = smov [#allocation6]   ;;  %s16_s19 = sshll.u32 %s307_s0, 4  ;;  %s17_s19 = int_to_ptr.hbm [resolvable:$true] %s16_s19 }
   0x3   :  { %s29_s16 = sshll.u32 %s262_s15, 4  ;;  %s263_s20 = smov [#allocation3]   ;;  %s30_s16 = int_to_ptr.vmem [resolvable:$true] %s29_s16 }
   0x4   :  { %32 = dma.hbm_to_vmem [thread:$0]  %s28_s14, 64, %s30_s16, [#allocation7]  }
   0x5   :  { %s18_s21 = sshll.u32 %s263_s20, 4  ;;  %s38_s24 = sshll.u32 %s309_s2, 4  ;;  %s19_s21 = int_to_ptr.vmem [resolvable:$true] %s18_s21  ;;  %s39_s24 = int_to_ptr.hbm [resolvable:$true] %s38_s24 }
   0x6   :  { %21 = dma.hbm_to_vmem [thread:$0]  %s17_s19, 32, %s19_s21, [#allocation4]  }
   0x7   :  { %s264_s1 = smov [#allocation8]  }
   0x8   :  { %s40_s25 = sshll.u32 %s264_s1, 4  ;;  %s41_s25 = int_to_ptr.vmem [resolvable:$true] %s40_s25 }
   0x9   :  { %43 = dma.hbm_to_vmem [thread:$0]  %s39_s24, 64, %s41_s25, [#allocation7]  }
   0xa   :  { %256 = dma.done.wait [#allocation4], 32  }
   0xb   :  { %257 = vsyncadd [#allocation4], 4294967264 }
   0xc   :  { %258 = dma.done.wait [#allocation7], 128  }
   0xd   :  { %259 = vsyncadd [#allocation7], 4294967168  ;;  %v60_v0 = vlaneseq  ;;  %v265_v2 = vmov 0.0   ;;  %v65_v3 = vld [vmem:[#allocation6] sm:$0xf]  ;;  %vm84_vm1 = vcmask 1041408  }
   0xe   :  { %v66_v4 = vld [vmem:[#allocation8] sm:$0xf]  ;;  %v67_v7 = vld [vmem:[#allocation3] sm:$0x3]  ;;  %vm102_vm2 = vcmask 1040384   ;;  %s266_s0 = smov [#allocation9]  }
   0xf   :  { %vm296_vm0 = vcmp.lt.s32.totalorder %v60_v0, 256  ;;  %v68_v5 = vsub.f32 %v65_v3, %v66_v4  ;;  %v71_v8 = vperm.slane %v67_v7, 0  ;;  %v72_v9 = vperm.slane %v67_v7, 1  ;;  %s140_s2 = sshll.u32 %s266_s0, 4  ;;  %s142_s28 = sshll.u32 %s310_s3, 4  ;;  %s141_s2 = int_to_ptr.vmem [resolvable:$true] %s140_s2  ;;  %s143_s28 = int_to_ptr.hbm [resolvable:$true] %s142_s28 }
  0x10   :  { %64 = vst.msk [vmem:[#allocation2] sm:$0x3] %vm296_vm0, %v265_v2 }
  0x11   :  { %v69_v6 = vmul.f32 %v68_v5, %v68_v5 }
  0x13   :  { %76 = vst [vmem:[#allocation1] ss:$4 sm:$0xff] %v69_v6 }
  0x17   :  { %v83_v28 = vld [vmem:[#allocation2] sm:$0x3] }
  0x1a   :  { %v77_v10 = vld.sshfl [vmem:[#allocation1] sm:$0xff pattern:$0x73625140]  ;;  %v78_v11 = vld.sshfl [vmem:[#allocation1 + $0x8] sm:$0xff pattern:$0x73625140] }
  0x1b   :  { %v81_v12 = vmul.f32 %v77_v10, %v71_v8  ;;  %v82_v13 = vmul.f32 %v78_v11, %v72_v9 }
  0x1d   :  { %v85_v14 = vsel %vm84_vm1, %v81_v12, 0.0  ;;  %v92_v15 = vsel %vm84_vm1, %v82_v13, 0.0 }
  0x1e   :  { %v86_v16 = vrot.slane %v85_v14, 4  ;;  %v93_v17 = vrot.slane %v92_v15, 4 }
  0x20   :  { %v87_v18 = vadd.f32 %v86_v16, %v85_v14  ;;  %v94_v19 = vadd.f32 %v93_v17, %v92_v15 }
  0x22   :  { %v88_v20 = vrot.slane %v87_v18, 2  ;;  %v95_v21 = vrot.slane %v94_v19, 2 }
  0x24   :  { %v89_v22 = vadd.f32 %v88_v20, %v87_v18  ;;  %v96_v23 = vadd.f32 %v95_v21, %v94_v19 }
  0x26   :  { %v90_v24 = vrot.slane %v89_v22, 1  ;;  %v97_v25 = vrot.slane %v96_v23, 1 }
  0x28   :  { %v91_v26 = vadd.f32 %v90_v24, %v89_v22  ;;  %v98_v27 = vadd.f32 %v97_v25, %v96_v23 }
  0x2a   :  { %v101_v29 = vrot.slane %v98_v27, 7 }
  0x2c   :  { %v103_v30 = vsel %vm102_vm2, %v91_v26, %v101_v29 }
  0x2d   :  { %v105_v31 = vadd.f32 %v103_v30, %v83_v28 }
  0x2f   :  { %110 = vst.msk [vmem:[#allocation2] sm:$0x3] %vm296_vm0, %v105_v31 }
  0x36   :  { %v114_v32 = vld [vmem:[#allocation2] sm:$0x3] }
  0x37   :  { %v116_v33 = vperm.slane %v114_v32, 0  ;;  %v117_v34 = vperm.slane %v114_v32, 1 }
  0x39   :  { %v120_v35 = vsel %vm102_vm2, %v116_v33, 0.0  ;;  %v121_v36 = vsel %vm102_vm2, %v117_v34, 0.0 }
  0x3a   :  { %v122_v37 = vadd.f32 %v121_v36, %v120_v35 }
  0x3c   :  { %123 = vadd.xlane.f32.xlu0 %v122_v37 }
  0xaf   :  { %v124_v38 = vpop.xlane.xlu0 %123 }
  0xb0   :  { %v125_v39 = vrot.slane %v124_v38, 4 }
  0xb2   :  { %v126_v40 = vadd.f32 %v125_v39, %v124_v38 }
  0xb4   :  { %v127_v41 = vrot.slane %v126_v40, 2 }
  0xb6   :  { %v128_v42 = vadd.f32 %v127_v41, %v126_v40 }
  0xb8   :  { %v129_v43 = vrot.slane %v128_v42, 1 }
  0xba   :  { %v130_v44 = vadd.f32 %v129_v43, %v128_v42 }
  0xbc   :  { %153 = vpush %v130_v44 }
  0xed   :  { %s154_s29 = spop %153 }
  0xee   :  { %v132_v45 = vstv %s154_s29 }
  0xef   :  { %134 = vst [vmem:[#allocation9] sm:$0xff] %v132_v45 }
  0xf0   :  { %145 = dma.vmem_to_hbm [thread:$0]  %s141_s2, 128, %s143_s28, [#allocation5]  }
  0xf1   :  { %260 = dma.done.wait [#allocation5], 128  }
  0xf2   :  { %261 = vsyncadd [#allocation5], 4294967168 }
  0xf3   :  { %150 = vsyncpa [#allocation4], 1 }
  0xf4   :  { %151 = vsyncpa [#allocation7], 1 }
  0xf5   :  { %152 = vsyncpa [#allocation5], 1 }

</bundles_post_ra>
